<compile_context>
chip_gen: v6e
topology: v6e:2x2x1
jax: 0.10.0
libtpu: 0.0.40
codegen_flags: <defaults>
</compile_context>

<pallas_src>
import functools

import jax
import jax.numpy as jnp
from jax.experimental import pallas as pl
from jax.experimental.pallas import tpu as pltpu

LANE = 128     # last-dim tiling unit (lanes)
SUBLANE = 8    # second-last-dim tiling unit (sublanes)


def _round_up(x, m):
    return (x + m - 1) // m * m


def _generator_kernel(x_ref, w1_ref, b1_ref, w2_ref, b2_ref, o_ref,
                      *, negative_slope):
    # Fused MLP: x @ W1^T + b1 -> LeakyReLU -> @ W2^T + b2, all VMEM-resident.
    x = x_ref[...]                                            # (tb, IN_PAD)  bf16
    h = jnp.dot(x, w1_ref[...],
                preferred_element_type=jnp.float32)           # (tb, HID_PAD) f32
    h = h + b1_ref[...]                                       # bias add in f32
    h = jnp.where(h > 0, h, negative_slope * h)               # LeakyReLU in f32
    y = jnp.dot(h.astype(w2_ref.dtype), w2_ref[...],
                preferred_element_type=jnp.float32)           # (tb, IN_PAD)  f32
    y = y + b2_ref[...]
    o_ref[...] = y.astype(o_ref.dtype)


def prepare_generator_params(w1, b1, w2, b2, *, compute_dtype=jnp.bfloat16):
    """One-time layout prep (call at init, NOT per forward):
      w1: (hidden, indim), b1: (hidden,), w2: (indim, hidden), b2: (indim,)
    Transposes to matmul layout, zero-pads feature dims to multiples of 128,
    and casts weights to the MXU compute dtype (biases stay f32)."""
    hidden, indim = w1.shape
    in_pad = _round_up(indim, LANE)
    hid_pad = _round_up(hidden, LANE)

    w1_t = jnp.zeros((in_pad, hid_pad), compute_dtype)
    w1_t = w1_t.at[:indim, :hidden].set(w1.T.astype(compute_dtype))
    w2_t = jnp.zeros((hid_pad, in_pad), compute_dtype)
    w2_t = w2_t.at[:hidden, :indim].set(w2.T.astype(compute_dtype))
    b1_r = jnp.zeros((1, hid_pad), jnp.float32).at[0, :hidden].set(
        b1.astype(jnp.float32))
    b2_r = jnp.zeros((1, in_pad), jnp.float32).at[0, :indim].set(
        b2.astype(jnp.float32))

    return {
        "w1_t": w1_t, "b1_r": b1_r, "w2_t": w2_t, "b2_r": b2_r,
        "indim": indim, "hidden": hidden,
        "in_pad": in_pad, "hid_pad": hid_pad,
        "compute_dtype": compute_dtype,
    }


def generator_forward(gemb, params, *, negative_slope=0.2, tb_target=256):
    """gemb: (B, indim) float. Returns (B, indim) in gemb.dtype."""
    B, indim = gemb.shape
    assert indim == params["indim"], "feature dim mismatch with prepared params"
    in_pad, hid_pad = params["in_pad"], params["hid_pad"]
    compute_dtype = params["compute_dtype"]
    out_dtype = gemb.dtype

    # Batch tiling: large tiles keep the MXU fed and amortize per-step overhead.
    # Small batches collapse to a single grid step; ragged B is zero-padded.
    tb = min(tb_target, _round_up(B, SUBLANE))
    b_pad = _round_up(B, tb)
    grid = (b_pad // tb,)

    # Cast activations to the MXU dtype; pad batch / feature dims only if
    # actually needed (avoids an extra HBM copy in the aligned common case).
    x = gemb.astype(compute_dtype)
    if (b_pad, in_pad) != (B, indim):
        x = jnp.pad(x, ((0, b_pad - B), (0, in_pad - indim)))

    w1_t, b1_r = params["w1_t"], params["b1_r"]
    w2_t, b2_r = params["w2_t"], params["b2_r"]

    kernel = functools.partial(_generator_kernel, negative_slope=negative_slope)

    flops = 2 * b_pad * in_pad * hid_pad + 2 * b_pad * hid_pad * in_pad
    bytes_accessed = (x.size * x.dtype.itemsize
                      + w1_t.size * w1_t.dtype.itemsize
                      + w2_t.size * w2_t.dtype.itemsize
                      + b1_r.size * b1_r.dtype.itemsize
                      + b2_r.size * b2_r.dtype.itemsize
                      + b_pad * in_pad * jnp.dtype(out_dtype).itemsize)

    out_pad = pl.pallas_call(
        kernel,
        out_shape=jax.ShapeDtypeStruct((b_pad, in_pad), out_dtype),
        grid_spec=pltpu.PrefetchScalarGridSpec(
            num_scalar_prefetch=0,
            grid=grid,
            in_specs=[
                pl.BlockSpec((tb, in_pad), lambda i: (i, 0)),       # x tile
                pl.BlockSpec((in_pad, hid_pad), lambda i: (0, 0)),  # W1^T (resident)
                pl.BlockSpec((1, hid_pad), lambda i: (0, 0)),       # b1
                pl.BlockSpec((hid_pad, in_pad), lambda i: (0, 0)),  # W2^T (resident)
                pl.BlockSpec((1, in_pad), lambda i: (0, 0)),        # b2
            ],
            out_specs=pl.BlockSpec((tb, in_pad), lambda i: (i, 0)),
        ),
        compiler_params=pltpu.CompilerParams(
            dimension_semantics=("parallel",)),
        cost_estimate=pl.CostEstimate(
            flops=flops, transcendentals=0, bytes_accessed=bytes_accessed),
    )(x, w1_t, b1_r, w2_t, b2_r)

    # Strip batch + lane padding (no-op slices when already aligned).
    if (b_pad, in_pad) != (B, indim):
        out_pad = out_pad[:B, :indim]
    return out_pad


def _init_linear(key, out_dim, in_dim, dtype=jnp.float32):
    # Deterministic PyTorch-style uniform init: U(-1/sqrt(in), 1/sqrt(in)).
    kw, kb = jax.random.split(key)
    bound = 1.0 / jnp.sqrt(jnp.float32(in_dim))
    w = jax.random.uniform(kw, (out_dim, in_dim), dtype, -bound, bound)
    b = jax.random.uniform(kb, (out_dim,), dtype, -bound, bound)
    return w, b


if __name__ == "__main__":
    key = jax.random.PRNGKey(0)
    k_x, k_l1, k_l2 = jax.random.split(key, 3)

    # Small shapes consistent with the module: Gemb (B, indim).
    B, indim, hidden = 16, 32, 128
    negative_slope = 0.2

    gemb = jax.random.normal(k_x, (B, indim), jnp.float32)
    w1, b1 = _init_linear(k_l1, hidden, indim)   # Linear(indim -> hidden)
    w2, b2 = _init_linear(k_l2, indim, hidden)   # Linear(hidden -> indim)

    # One-time param prep (transpose + pad + bf16 cast).
    params = prepare_generator_params(w1, b1, w2, b2)

    out = generator_forward(gemb, params, negative_slope=negative_slope)
    out = jax.block_until_ready(out)

    # Pure-JAX f32 reference (kernel uses bf16 MXU inputs with f32 accumulation,
    # so compare with a bf16-appropriate tolerance).
    h_ref = gemb @ w1.T + b1
    h_ref = jnp.where(h_ref > 0, h_ref, negative_slope * h_ref)
    ref = h_ref @ w2.T + b2
    assert out.shape == (B, indim)
    max_err = jnp.max(jnp.abs(out - ref))
    assert jnp.allclose(out, ref, atol=2e-2, rtol=2e-2), \
        f"max abs err {max_err}"

    print("KERNEL_OK")
</pallas_src>

<mosaic_0001>
module attributes {stable_mosaic.version = 11 : i64} {
  func.func @_generator_kernel(%arg0: i32, %arg1: memref<16x128xbf16, #tpu.memory_space<vmem>>, %arg2: memref<128x128xbf16, #tpu.memory_space<vmem>>, %arg3: memref<1x128xf32, #tpu.memory_space<vmem>>, %arg4: memref<128x128xbf16, #tpu.memory_space<vmem>>, %arg5: memref<1x128xf32, #tpu.memory_space<vmem>>, %arg6: memref<16x128xf32, #tpu.memory_space<vmem>>) attributes {dimension_semantics = [#tpu.dimension_semantics<parallel>], iteration_bounds = array<i64: 1>, scalar_prefetch = 0 : i64, scratch_operands = 0 : i64, tpu.core_type = #tpu.core_type<tc>, window_params = [{transform_indices = @transform_0, window_bounds = array<i64: 16, 128>}, {pipeline_mode = #tpu.pipeline_mode<synchronous>, transform_indices = @transform_1, window_bounds = array<i64: 128, 128>}, {pipeline_mode = #tpu.pipeline_mode<synchronous>, transform_indices = @transform_2, window_bounds = array<i64: 1, 128>}, {pipeline_mode = #tpu.pipeline_mode<synchronous>, transform_indices = @transform_3, window_bounds = array<i64: 128, 128>}, {pipeline_mode = #tpu.pipeline_mode<synchronous>, transform_indices = @transform_4, window_bounds = array<i64: 1, 128>}, {transform_indices = @transform_5, window_bounds = array<i64: 16, 128>}]} {
    %c0 = arith.constant 0 : index
    %c0_0 = arith.constant 0 : index
    %0 = vector.load %arg1[%c0, %c0_0] : memref<16x128xbf16, #tpu.memory_space<vmem>>, vector<16x128xbf16>
    %c0_1 = arith.constant 0 : index
    %c0_2 = arith.constant 0 : index
    %1 = vector.load %arg2[%c0_1, %c0_2] : memref<128x128xbf16, #tpu.memory_space<vmem>>, vector<128x128xbf16>
    %cst = arith.constant dense<0.000000e+00> : vector<16x128xf32>
    %2 = tpu.matmul %0, %1, %cst {dimension_numbers = #tpu.dot_dimension_numbers<[1], [0], [0], [1], [0, 0, 1, 1], [], []>} : vector<16x128xbf16>, vector<128x128xbf16>, vector<16x128xf32> -> vector<16x128xf32>
    %c0_3 = arith.constant 0 : index
    %c0_4 = arith.constant 0 : index
    %3 = vector.load %arg3[%c0_3, %c0_4] : memref<1x128xf32, #tpu.memory_space<vmem>>, vector<1x128xf32>
    %4 = vector.broadcast %3 : vector<1x128xf32> to vector<16x128xf32>
    %5 = arith.addf %2, %4 : vector<16x128xf32>
    %cst_5 = arith.constant 0.000000e+00 : f32
    %6 = vector.broadcast %cst_5 : f32 to vector<16x128xf32>
    %7 = arith.cmpf ogt, %5, %6 : vector<16x128xf32>
    %cst_6 = arith.constant 2.000000e-01 : f32
    %8 = vector.broadcast %cst_6 : f32 to vector<16x128xf32>
    %9 = arith.mulf %8, %5 : vector<16x128xf32>
    %10 = arith.select %7, %5, %9 : vector<16x128xi1>, vector<16x128xf32>
    %11 = arith.truncf %10 : vector<16x128xf32> to vector<16x128xbf16>
    %c0_7 = arith.constant 0 : index
    %c0_8 = arith.constant 0 : index
    %12 = vector.load %arg4[%c0_7, %c0_8] : memref<128x128xbf16, #tpu.memory_space<vmem>>, vector<128x128xbf16>
    %cst_9 = arith.constant dense<0.000000e+00> : vector<16x128xf32>
    %13 = tpu.matmul %11, %12, %cst_9 {dimension_numbers = #tpu.dot_dimension_numbers<[1], [0], [0], [1], [0, 0, 1, 1], [], []>} : vector<16x128xbf16>, vector<128x128xbf16>, vector<16x128xf32> -> vector<16x128xf32>
    %c0_10 = arith.constant 0 : index
    %c0_11 = arith.constant 0 : index
    %14 = vector.load %arg5[%c0_10, %c0_11] : memref<1x128xf32, #tpu.memory_space<vmem>>, vector<1x128xf32>
    %15 = vector.broadcast %14 : vector<1x128xf32> to vector<16x128xf32>
    %16 = arith.addf %13, %15 : vector<16x128xf32>
    %c0_12 = arith.constant 0 : index
    %c0_13 = arith.constant 0 : index
    %17 = vector.load %arg6[%c0_12, %c0_13] : memref<16x128xf32, #tpu.memory_space<vmem>>, vector<16x128xf32>
    tpu.vector_store %arg6[%c0_12, %c0_13], %16 {strides = array<i32>} : memref<16x128xf32, #tpu.memory_space<vmem>>, vector<16x128xf32>,
    return
  }
  func.func @transform_0(%arg0: i32) -> (i32, i32) {
    %c0_i32 = arith.constant 0 : i32
    %c0_i32_0 = arith.constant 0 : i32
    return %arg0, %c0_i32 : i32, i32
  }
  func.func @transform_1(%arg0: i32) -> (i32, i32) {
    %c0_i32 = arith.constant 0 : i32
    %c0_i32_0 = arith.constant 0 : i32
    %c0_i32_1 = arith.constant 0 : i32
    return %c0_i32, %c0_i32_0 : i32, i32
  }
  func.func @transform_2(%arg0: i32) -> (i32, i32) {
    %c0_i32 = arith.constant 0 : i32
    %c0_i32_0 = arith.constant 0 : i32
    %c0_i32_1 = arith.constant 0 : i32
    return %c0_i32, %c0_i32_0 : i32, i32
  }
  func.func @transform_3(%arg0: i32) -> (i32, i32) {
    %c0_i32 = arith.constant 0 : i32
    %c0_i32_0 = arith.constant 0 : i32
    %c0_i32_1 = arith.constant 0 : i32
    return %c0_i32, %c0_i32_0 : i32, i32
  }
  func.func @transform_4(%arg0: i32) -> (i32, i32) {
    %c0_i32 = arith.constant 0 : i32
    %c0_i32_0 = arith.constant 0 : i32
    %c0_i32_1 = arith.constant 0 : i32
    return %c0_i32, %c0_i32_0 : i32, i32
  }
  func.func @transform_5(%arg0: i32) -> (i32, i32) {
    %c0_i32 = arith.constant 0 : i32
    %c0_i32_0 = arith.constant 0 : i32
    return %arg0, %c0_i32 : i32, i32
  }
}

</mosaic_0001>

<bundles_post_ra>
// kernel: tpu_custom_call.1
= control target key start
LH: loop header
LB: loop body
LE: loop exit
PB: predicated region body
PF: predicated region fallthrough
CT: control target
= control target key end

     0   :  { %10 = vsyncpa [#allocation3], 0  ;;  %s570_s0 = inlined_call_operand.hbm [shape: bf16[16,128], index: 0, kind: input, shape index: {}]   ;;  %s571_s1 = inlined_call_operand.hbm [shape: bf16[128,128], index: 1, kind: input, shape index: {}]   ;;  %s572_s2 = inlined_call_operand.vmem [shape: f32[1,128], index: 2, kind: input, shape index: {}]   ;;  %s573_s3 = inlined_call_operand.hbm [shape: bf16[128,128], index: 3, kind: input, shape index: {}]   ;;  %s574_s4 = inlined_call_operand.vmem [shape: f32[1,128], index: 4, kind: input, shape index: {}]   ;;  %s575_s5 = inlined_call_operand.hbm [shape: f32[16,128], index: 5, kind: output, shape index: {}]  }
   0x1   :  { %11 = vsyncpa [#allocation6], 0 }
   0x2   :  { %12 = vsyncpa [#allocation4], 0  ;;  %s512_s18 = smov [#allocation5]   ;;  %s513_s20 = smov [#allocation2]  }
   0x3   :  { %s30_s19 = sshll.u32 %s512_s18, 4  ;;  %s18_s21 = sshll.u32 %s513_s20, 4  ;;  %s31_s19 = int_to_ptr.vmem [resolvable:$true] %s30_s19  ;;  %s19_s21 = int_to_ptr.vmem [resolvable:$true] %s18_s21 }
   0x4   :  { %s434_s22 = scalar_lea.vmem %s31_s19, 1024  ;;  %p439_p1 = scmp.lt.s32.totalorder %s31_s19, %s31_s19 }
   0x5   :  { %p435_p0 = scmp.ne.s32.totalorder %s31_s19, %s434_s22  ;;  %p440_p2 = scmp.lt.s32.totalorder %s434_s22, %s434_s22 }
   0x7   :  { %p441_p3 = por %p440_p2, %p439_p1 }
   0x9   :  { %p442_p4 = pnand %p441_p3, %p435_p0 }
   0xb   :  { %445 = shalt.err (!%p442_p4)
}
   0xc   :  { %s514_s23 = smov 64   ;;  %s515_s24 = smov 4  }
   0xd   :  { %36 = dma.hbm_to_vmem [thread:$0]  %s571_s1, 1024, %s31_s19, [#allocation6], %s514_s23, %s514_s23, %s515_s24  }
   0xe   :  { %s454_s27 = scalar_lea.vmem %s19_s21, 128  ;;  %p459_p6 = scmp.lt.s32.totalorder %s19_s21, %s19_s21 }
   0xf   :  { %p455_p5 = scmp.ne.s32.totalorder %s19_s21, %s454_s27  ;;  %p460_p7 = scmp.lt.s32.totalorder %s454_s27, %s454_s27 }
  0x11   :  { %p461_p8 = por %p460_p7, %p459_p6 }
  0x13   :  { %p462_p9 = pnand %p461_p8, %p455_p5 }
  0x15   :  { %465 = shalt.err (!%p462_p9)
}
  0x16   :  { %24 = dma.hbm_to_vmem [thread:$0]  %s570_s0, 128, %s19_s21, [#allocation3], %s514_s23, %s514_s23, %s515_s24  }
  0x17   :  { %s516_s30 = smov [#allocation7]  }
  0x18   :  { %s44_s6 = sshll.u32 %s516_s30, 4  ;;  %s45_s6 = int_to_ptr.vmem [resolvable:$true] %s44_s6 }
  0x19   :  { %s474_s7 = scalar_lea.vmem %s45_s6, 1024  ;;  %p479_p11 = scmp.lt.s32.totalorder %s45_s6, %s45_s6 }
  0x1a   :  { %p475_p10 = scmp.ne.s32.totalorder %s45_s6, %s474_s7  ;;  %p480_p12 = scmp.lt.s32.totalorder %s474_s7, %s474_s7 }
  0x1c   :  { %p481_p13 = por %p480_p12, %p479_p11 }
  0x1e   :  { %p482_p0 = pnand %p481_p13, %p475_p10 }
  0x20   :  { %485 = shalt.err (!%p482_p0)
}
  0x21   :  { %50 = dma.hbm_to_vmem [thread:$0]  %s573_s3, 1024, %s45_s6, [#allocation6], %s514_s23, %s514_s23, %s515_s24  }
  0x22   :  { %506 = dma.done.wait [#allocation3], 128  }
  0x23   :  { %507 = vsyncadd [#allocation3], 4294967168 }
  0x24   :  { %508 = dma.done.wait [#allocation6], 2048  }
  0x25   :  { %509 = vsyncadd [#allocation6], 4294965248  ;;  %v517_v0 = vmov 0.0   ;;  %vm518_vm0 = vmmov 0   ;;  %v409_v1 = vld [vmem:[#allocation5 + $0x38] sm:$0xff]   ;;  %v410_v2 = vld [vmem:[#allocation5 + $0x30] sm:$0xff]  }
  0x26   :  { %359 = vmatprep.subr.bf16.mxu0 %v517_v0  ;;  %375 = vmatprep.mubr.msk.bf16.mxu0 %vm518_vm0, %v517_v0  ;;  %v411_v3 = vld [vmem:[#allocation5 + $0x28] sm:$0xff]   ;;  %v418_v4 = vld [vmem:[#allocation7 + $0x38] sm:$0xff]   ;;  %v412_v5 = vld [vmem:[#allocation5 + $0x20] sm:$0xff]  }
  0x27   :  { %379 = vmatprep.subr.bf16.mxu1 %v517_v0  ;;  %395 = vmatprep.mubr.msk.bf16.mxu1 %vm518_vm0, %v517_v0  ;;  %v419_v6 = vld [vmem:[#allocation7 + $0x30] sm:$0xff]   ;;  %v413_v7 = vld [vmem:[#allocation5 + $0x18] sm:$0xff]   ;;  %v420_v8 = vld [vmem:[#allocation7 + $0x28] sm:$0xff]  }
  0x28   :  { %360 = vmatpush3.bf16.msra.mxu0 %v409_v1  ;;  %380 = vmatpush3.bf16.msra.mxu1 %v418_v4  ;;  %v414_v9 = vld [vmem:[#allocation5 + $0x10] sm:$0xff]   ;;  %v421_v10 = vld [vmem:[#allocation7 + $0x20] sm:$0xff]   ;;  %v415_v11 = vld [vmem:[#allocation5 + $0x8] sm:$0xff]  }
  0x29   :  { %361 = vmatprep.subr.bf16.mxu0 %v517_v0  ;;  %381 = vmatprep.subr.bf16.mxu1 %v517_v0  ;;  %v422_v12 = vld [vmem:[#allocation7 + $0x18] sm:$0xff]   ;;  %v416_v13 = vld [vmem:[#allocation5] sm:$0xff]   ;;  %v423_v15 = vld [vmem:[#allocation7 + $0x10] sm:$0xff]  }
  0x2a   :  { %v417_v14 = vld [vmem:[#allocation2] sm:$0xff]   ;;  %v424_v16 = vld [vmem:[#allocation7 + $0x8] sm:$0xff]   ;;  %v425_v17 = vld [vmem:[#allocation7] sm:$0xff]  }
  0x2b   :  { %v322_v18 = vld [vmem:[%s572_s2] ss:$0 sm:$0xff]  ;;  %s519_s2 = smov [#allocation8]  }
  0x2c   :  { %362 = vmatpush3.bf16.msra.mxu0 %v410_v2  ;;  %382 = vmatpush3.bf16.msra.mxu1 %v419_v6  ;;  %v332_v30 = vld [vmem:[%s574_s4] ss:$0 sm:$0xff]  ;;  %s309_s11 = sshll.u32 %s519_s2, 4  ;;  %s310_s11 = int_to_ptr.vmem [resolvable:$true] %s309_s11 }
  0x2d   :  { %363 = vmatprep.subr.bf16.mxu0 %v517_v0  ;;  %383 = vmatprep.subr.bf16.mxu1 %v517_v0  ;;  %s486_s12 = scalar_lea.vmem %s310_s11, 256  ;;  %p491_p2 = scmp.lt.s32.totalorder %s310_s11, %s310_s11 }
  0x2e   :  { %p487_p1 = scmp.ne.s32.totalorder %s310_s11, %s486_s12  ;;  %p492_p3 = scmp.lt.s32.totalorder %s486_s12, %s486_s12 }
  0x30   :  { %364 = vmatpush3.bf16.msra.mxu0 %v411_v3  ;;  %384 = vmatpush3.bf16.msra.mxu1 %v420_v8  ;;  %p493_p4 = por %p492_p3, %p491_p2 }
  0x31   :  { %365 = vmatprep.subr.bf16.mxu0 %v517_v0  ;;  %385 = vmatprep.subr.bf16.mxu1 %v517_v0 }
  0x32   :  { %p494_p5 = pnand %p493_p4, %p487_p1 }
  0x34   :  { %366 = vmatpush3.bf16.msra.mxu0 %v412_v5  ;;  %386 = vmatpush3.bf16.msra.mxu1 %v421_v10 }
  0x35   :  { %367 = vmatprep.subr.bf16.mxu0 %v517_v0  ;;  %387 = vmatprep.subr.bf16.mxu1 %v517_v0 }
  0x38   :  { %368 = vmatpush3.bf16.msra.mxu0 %v413_v7  ;;  %388 = vmatpush3.bf16.msra.mxu1 %v422_v12 }
  0x39   :  { %369 = vmatprep.subr.bf16.mxu0 %v517_v0  ;;  %389 = vmatprep.subr.bf16.mxu1 %v517_v0 }
  0x3c   :  { %370 = vmatpush3.bf16.msra.mxu0 %v414_v9  ;;  %390 = vmatpush3.bf16.msra.mxu1 %v423_v15 }
  0x3d   :  { %371 = vmatprep.subr.bf16.mxu0 %v517_v0  ;;  %391 = vmatprep.subr.bf16.mxu1 %v517_v0 }
  0x40   :  { %372 = vmatpush3.bf16.msra.mxu0 %v415_v11  ;;  %392 = vmatpush3.bf16.msra.mxu1 %v424_v16 }
  0x41   :  { %373 = vmatprep.subr.bf16.mxu0 %v517_v0  ;;  %393 = vmatprep.subr.bf16.mxu1 %v517_v0 }
  0x44   :  { %374 = vmatpush3.bf16.msra.mxu0 %v416_v13  ;;  %394 = vmatpush3.bf16.msra.mxu1 %v425_v17 }
  0x47   :  { %376 = vmatmul.mubr.bf16.vlgmr.msra.gmra.mxu0 %v417_v14 }
 0x107   :  { %v176_v19 = vpop.f32.mrf.mxu0 }
 0x108   :  { %v177_v20 = vadd.f32 %v322_v18, %v176_v19 }
 0x109   :  { %v377_v21 = vpop.f32.mrf.mxu0 }
 0x10a   :  { %v185_v23 = vmul.f32 0.2, %v177_v20  ;;  %vm183_vm1 = vcmp.gt.f32.partialorder %v177_v20, 0.0 }
 0x10b   :  { %v179_v22 = vpop.f32.mrf.mxu0 }
 0x10c   :  { %v180_v24 = vadd.f32 %v322_v18, %v179_v22  ;;  %v187_v27 = vsel %vm183_vm1, %v177_v20, %v185_v23 }
 0x10d   :  { %v378_v25 = vpop.f32.mrf.mxu0 }
 0x10e   :  { %vm184_vm2 = vcmp.gt.f32.partialorder %v180_v24, 0.0  ;;  %v186_v26 = vmul.f32 0.2, %v180_v24 }
 0x110   :  { %v188_v28 = vsel %vm184_vm2, %v180_v24, %v186_v26 }
 0x111   :  { %v189_v29 = vpack.c.bf16 %v188_v28, %v187_v27 }
 0x113   :  { %396 = vmatmul.mubr.bf16.vlgmr.msra.gmra.mxu1 %v189_v29 }
 0x1d3   :  { %v295_v31 = vpop.f32.mrf.mxu1 }
 0x1d4   :  { %v296_v32 = vadd.f32 %v332_v30, %v295_v31 }
 0x1d5   :  { %v397_v33 = vpop.f32.mrf.mxu1 }
 0x1d6   :  { %302 = vst [vmem:[#allocation8] sm:$0xff] %v296_v32 }
 0x1d7   :  { %v298_v34 = vpop.f32.mrf.mxu1 }
 0x1d8   :  { %v299_v35 = vadd.f32 %v332_v30, %v298_v34 }
 0x1d9   :  { %v398_v36 = vpop.f32.mrf.mxu1 }
 0x1da   :  { %303 = vst [vmem:[#allocation8 + $0x8] sm:$0xff] %v299_v35 }
 0x1db   :  { %497 = shalt.err (!%p494_p5)
}
 0x1dc   :  { %s520_s13 = smov 128   ;;  %s521_s4 = smov 8  }
 0x1dd   :  { %315 = dma.vmem_to_hbm [thread:$0]  %s310_s11, 256, %s575_s5, [#allocation4], %s520_s13, %s520_s13, %s521_s4  }
 0x1de   :  { %510 = dma.done.wait [#allocation4], 256  }
 0x1df   :  { %511 = vsyncadd [#allocation4], 4294967040 }
 0x1e0   :  { %319 = vsyncpa [#allocation3], 1 }
 0x1e1   :  { %320 = vsyncpa [#allocation6], 1 }
 0x1e2   :  { %321 = vsyncpa [#allocation4], 1 }

</bundles_post_ra>
